<compile_context>
chip_gen: v5e
topology: v5e:2x2
jax: 0.10.0
libtpu: 0.0.40
codegen_flags: <defaults>
</compile_context>

<pallas_src>
import jax
import jax.numpy as jnp
from jax import lax
from jax.experimental import pallas as pl
from jax.experimental.pallas import tpu as pltpu

HIDDEN = 128
LANE = 128


def _round_up(x, m):
    return ((x + m - 1) // m) * m


def critic_kernel(x_ref, w1_ref, b1_ref, w2_ref, b2_ref, out_ref):
    """One batch tile of the Critic MLP.

    x:   (TB, S)    f32  (streamed over the batch grid; cast to bf16 in-kernel)
    w1:  (S, 128)   bf16 (resident: constant index_map)
    b1:  (1, 128)   f32
    w2:  (1, 128)   bf16 (PyTorch layout: (out=1, in=128))
    b2:  (1, 1)     f32  (SMEM scalar)
    out: (1, 1, TB) f32  (lane-dense row of per-sample values)
    """
    # In-kernel f32 -> bf16 cast: free VPU filler; avoids the wrapper-side cast
    # that would double HBM traffic on the x stream.
    x_bf = x_ref[...].astype(jnp.bfloat16)

    # Layer 1 on the MXU (bf16 operands, f32 accumulation), bias + ReLU on VPU.
    h = jnp.dot(x_bf, w1_ref[...], preferred_element_type=jnp.float32)   # (TB,128) f32
    h = jnp.maximum(h + b1_ref[...], 0.0)

    # Layer 2 as (1,128) . (TB,128)^T -> (1, TB): result lands lane-dense so the
    # store is a run of unmasked 128-wide vst (TB is a multiple of 128).
    # bf16 operands keep the MXU single-pass on v5e/v6e; accumulation stays f32.
    v = lax.dot_general(
        w2_ref[...], h.astype(jnp.bfloat16),
        dimension_numbers=(((1,), (1,)), ((), ())),
        preferred_element_type=jnp.float32)                              # (1, TB)
    out_ref[...] = (v + b2_ref[0, 0])[None]                              # (1, 1, TB)


def prepare_critic_params(w1, b1, w2, b2):
    """One-time parameter prep (hoisted out of the per-call path).

    w1: (state_dim, 128) (= torch weight1.T)   b1: (128,)
    w2: (1, 128)         (= torch weight2)     b2: () scalar
    """
    w1_bf = jnp.asarray(w1, jnp.float32).astype(jnp.bfloat16)                 # (S,128)
    b1_2d = jnp.asarray(b1, jnp.float32).reshape(1, HIDDEN)                   # (1,128)
    w2_bf = jnp.asarray(w2, jnp.float32).reshape(1, HIDDEN).astype(jnp.bfloat16)
    b2_2d = jnp.asarray(b2, jnp.float32).reshape(1, 1)                        # SMEM scalar
    return w1_bf, b1_2d, w2_bf, b2_2d


def critic_forward(x, params, *, tb_max=8192, min_grid_steps=1):
    """x: (B, state_dim) f32 -> (B,) f32   (matches Critic.forward + squeeze(-1)).

    params: output of prepare_critic_params.
    min_grid_steps: set to 2 on v7x so the "parallel" batch axis shards across
    both TensorCores; leave at 1 on v5e/v6e (single TC -> biggest tile wins).
    """
    w1_bf, b1_2d, w2_bf, b2_2d = params
    B, S = x.shape

    # Batch tile: multiple of 128 lanes. Big tiles amortize the ~0.35 us/step
    # grid overhead; a TB=8192 f32 x-tile (lane-padded 32->128) is ~4 MiB, so
    # 8 MiB double-buffered -- comfortable even on v7x's 64 MiB physical VMEM.
    TB = min(_round_up(tb_max, LANE), _round_up(B, LANE))
    if min_grid_steps > 1:
        TB = max(LANE, min(TB, _round_up(pl.cdiv(_round_up(B, LANE), min_grid_steps), LANE)))
    padded_B = _round_up(B, TB)
    num_tiles = padded_B // TB
    if padded_B != B:
        # Padded rows compute ReLU(b1)@w2 + b2 (garbage); sliced off below.
        x = jnp.pad(x, ((0, padded_B - B), (0, 0)))

    # Explicit scoped-VMEM limit: covers large TB on v5e's 16 MiB default while
    # staying well under v7x's 64 MiB physical.
    x_tile_bytes = TB * _round_up(S, LANE) * 4            # f32, lane-padded
    out_tile_bytes = 8 * TB * 4                            # (1,1,TB) f32, sublane-padded
    param_bytes = _round_up(S, 16) * LANE * 2 + 8 * LANE * 4 + 16 * LANE * 2
    vmem_bytes = 2 * (x_tile_bytes + out_tile_bytes + param_bytes) + (2 << 20)
    vmem_bytes = int(min(max(vmem_bytes, 8 << 20), 48 << 20))

    out = pl.pallas_call(
        critic_kernel,
        out_shape=jax.ShapeDtypeStruct((num_tiles, 1, TB), jnp.float32),
        grid=(num_tiles,),
        in_specs=[
            pl.BlockSpec((TB, S), lambda i: (i, 0)),            # x: one batch tile per step
            pl.BlockSpec((S, HIDDEN), lambda i: (0, 0)),        # w1: resident (no re-DMA)
            pl.BlockSpec((1, HIDDEN), lambda i: (0, 0)),        # b1: resident
            pl.BlockSpec((1, HIDDEN), lambda i: (0, 0)),        # w2: resident
            pl.BlockSpec(memory_space=pltpu.MemorySpace.SMEM),  # b2: scalar in SMEM
        ],
        out_specs=pl.BlockSpec((1, 1, TB), lambda i: (i, 0, 0)),
        compiler_params=pltpu.CompilerParams(
            dimension_semantics=("parallel",),
            vmem_limit_bytes=vmem_bytes),
        cost_estimate=pl.CostEstimate(
            flops=2 * padded_B * S * HIDDEN + 2 * padded_B * HIDDEN,
            transcendentals=0,
            bytes_accessed=(padded_B * S * 4 + padded_B * 4
                            + S * HIDDEN * 2 + HIDDEN * 4 + HIDDEN * 2 + 4)),
    )(x, w1_bf, b1_2d, w2_bf, b2_2d)

    # Keep the [:B] slice -- it drops the padded (garbage) batch rows.
    return out.reshape(padded_B)[:B]


def init_critic_params(key, state_dim):
    """Deterministic init mimicking PyTorch nn.Linear default U[-1/sqrt(fan_in), +]."""
    k1, k2, k3, k4 = jax.random.split(key, 4)
    bound1 = 1.0 / jnp.sqrt(jnp.float32(state_dim))
    bound2 = 1.0 / jnp.sqrt(jnp.float32(HIDDEN))
    w1 = jax.random.uniform(k1, (state_dim, HIDDEN), jnp.float32, -bound1, bound1)
    b1 = jax.random.uniform(k2, (HIDDEN,), jnp.float32, -bound1, bound1)
    w2 = jax.random.uniform(k3, (1, HIDDEN), jnp.float32, -bound2, bound2)
    b2 = jax.random.uniform(k4, (), jnp.float32, -bound2, bound2)
    return w1, b1, w2, b2


def critic_reference(x, w1, b1, w2, b2):
    """Plain-JAX reference with the same bf16 quantization the kernel applies
    (x, w1 for layer 1; h, w2 for layer 2), f32 accumulation."""
    xq = x.astype(jnp.bfloat16).astype(jnp.float32)
    w1q = w1.astype(jnp.bfloat16).astype(jnp.float32)
    h = jnp.maximum(
        jnp.dot(xq, w1q, precision=lax.Precision.HIGHEST) + b1[None, :], 0.0)
    hq = h.astype(jnp.bfloat16).astype(jnp.float32)
    w2q = w2.reshape(HIDDEN).astype(jnp.bfloat16).astype(jnp.float32)
    return jnp.dot(hq, w2q, precision=lax.Precision.HIGHEST) + b2


if __name__ == "__main__":
    key = jax.random.PRNGKey(0)
    k_param, k_x1, k_x2 = jax.random.split(key, 3)

    # Shapes implied by the module: a small batch of state vectors.
    batch, state_dim = 8, 32
    x = jax.random.normal(k_x1, (batch, state_dim), jnp.float32)
    w1, b1, w2, b2 = init_critic_params(k_param, state_dim)
    params = prepare_critic_params(w1, b1, w2, b2)   # one-time prep

    out = jax.block_until_ready(critic_forward(x, params))
    ref = critic_reference(x, w1, b1, w2, b2)
    assert out.shape == (batch,)
    assert jnp.allclose(out, ref, atol=5e-3, rtol=5e-3), \
        float(jnp.max(jnp.abs(out - ref)))

    # Second run: exercise the multi-tile batch grid + ragged-batch padding path.
    batch2 = 300
    x2 = jax.random.normal(k_x2, (batch2, state_dim), jnp.float32)
    out2 = jax.block_until_ready(critic_forward(x2, params, tb_max=128))
    ref2 = critic_reference(x2, w1, b1, w2, b2)
    assert out2.shape == (batch2,)
    assert jnp.allclose(out2, ref2, atol=5e-3, rtol=5e-3), \
        float(jnp.max(jnp.abs(out2 - ref2)))

    print("KERNEL_OK")
</pallas_src>

<mosaic_0001>
module attributes {stable_mosaic.version = 11 : i64} {
  func.func @critic_kernel(%arg0: i32, %arg1: memref<128x32xf32, #tpu.memory_space<vmem>>, %arg2: memref<32x128xbf16, #tpu.memory_space<vmem>>, %arg3: memref<1x128xf32, #tpu.memory_space<vmem>>, %arg4: memref<1x128xbf16, #tpu.memory_space<vmem>>, %arg5: memref<1x1xf32, #tpu.memory_space<smem>>, %arg6: memref<1x1x128xf32, #tpu.memory_space<vmem>>) attributes {dimension_semantics = [#tpu.dimension_semantics<parallel>], iteration_bounds = array<i64: 1>, scalar_prefetch = 0 : i64, scratch_operands = 0 : i64, tpu.core_type = #tpu.core_type<tc>, window_params = [{transform_indices = @transform_0, window_bounds = array<i64: 128, 32>}, {pipeline_mode = #tpu.pipeline_mode<synchronous>, transform_indices = @transform_1, window_bounds = array<i64: 32, 128>}, {pipeline_mode = #tpu.pipeline_mode<synchronous>, transform_indices = @transform_2, window_bounds = array<i64: 1, 128>}, {pipeline_mode = #tpu.pipeline_mode<synchronous>, transform_indices = @transform_3, window_bounds = array<i64: 1, 128>}, {transform_indices = @transform_4, window_bounds = array<i64: 1, 1>}, {transform_indices = @transform_5, window_bounds = array<i64: 1, 1, 128>}]} {
    %c0 = arith.constant 0 : index
    %c0_0 = arith.constant 0 : index
    %0 = vector.load %arg1[%c0, %c0_0] : memref<128x32xf32, #tpu.memory_space<vmem>>, vector<128x32xf32>
    %1 = arith.truncf %0 : vector<128x32xf32> to vector<128x32xbf16>
    %c0_1 = arith.constant 0 : index
    %c0_2 = arith.constant 0 : index
    %2 = vector.load %arg2[%c0_1, %c0_2] : memref<32x128xbf16, #tpu.memory_space<vmem>>, vector<32x128xbf16>
    %cst = arith.constant dense<0.000000e+00> : vector<128x128xf32>
    %3 = tpu.matmul %1, %2, %cst {dimension_numbers = #tpu.dot_dimension_numbers<[1], [0], [0], [1], [0, 0, 1, 1], [], []>} : vector<128x32xbf16>, vector<32x128xbf16>, vector<128x128xf32> -> vector<128x128xf32>
    %c0_3 = arith.constant 0 : index
    %c0_4 = arith.constant 0 : index
    %4 = vector.load %arg3[%c0_3, %c0_4] : memref<1x128xf32, #tpu.memory_space<vmem>>, vector<1x128xf32>
    %5 = vector.broadcast %4 : vector<1x128xf32> to vector<128x128xf32>
    %6 = arith.addf %3, %5 : vector<128x128xf32>
    %cst_5 = arith.constant 0.000000e+00 : f32
    %7 = vector.broadcast %cst_5 : f32 to vector<128x128xf32>
    %8 = arith.maximumf %6, %7 : vector<128x128xf32>
    %c0_6 = arith.constant 0 : index
    %c0_7 = arith.constant 0 : index
    %9 = vector.load %arg4[%c0_6, %c0_7] : memref<1x128xbf16, #tpu.memory_space<vmem>>, vector<1x128xbf16>
    %10 = arith.truncf %8 : vector<128x128xf32> to vector<128x128xbf16>
    %cst_8 = arith.constant dense<0.000000e+00> : vector<1x128xf32>
    %11 = tpu.matmul %9, %10, %cst_8 {dimension_numbers = #tpu.dot_dimension_numbers<[1], [1], [0], [0], [0, 0, 1, 0], [], []>} : vector<1x128xbf16>, vector<128x128xbf16>, vector<1x128xf32> -> vector<1x128xf32>
    %c0_9 = arith.constant 0 : index
    %c0_10 = arith.constant 0 : index
    %12 = memref.load %arg5[%c0_9, %c0_10] : memref<1x1xf32, #tpu.memory_space<smem>>
    %13 = vector.broadcast %12 : f32 to vector<1x128xf32>
    %14 = arith.addf %11, %13 : vector<1x128xf32>
    %15 = vector.shape_cast %14 : vector<1x128xf32> to vector<1x1x128xf32>
    %c0_11 = arith.constant 0 : index
    %c0_12 = arith.constant 0 : index
    %c0_13 = arith.constant 0 : index
    %16 = vector.load %arg6[%c0_11, %c0_12, %c0_13] : memref<1x1x128xf32, #tpu.memory_space<vmem>>, vector<1x1x128xf32>
    tpu.vector_store %arg6[%c0_11, %c0_12, %c0_13], %15 {strides = array<i32>} : memref<1x1x128xf32, #tpu.memory_space<vmem>>, vector<1x1x128xf32>,
    return
  }
  func.func @transform_0(%arg0: i32) -> (i32, i32) {
    %c0_i32 = arith.constant 0 : i32
    %c0_i32_0 = arith.constant 0 : i32
    return %arg0, %c0_i32 : i32, i32
  }
  func.func @transform_1(%arg0: i32) -> (i32, i32) {
    %c0_i32 = arith.constant 0 : i32
    %c0_i32_0 = arith.constant 0 : i32
    %c0_i32_1 = arith.constant 0 : i32
    return %c0_i32, %c0_i32_0 : i32, i32
  }
  func.func @transform_2(%arg0: i32) -> (i32, i32) {
    %c0_i32 = arith.constant 0 : i32
    %c0_i32_0 = arith.constant 0 : i32
    %c0_i32_1 = arith.constant 0 : i32
    return %c0_i32, %c0_i32_0 : i32, i32
  }
  func.func @transform_3(%arg0: i32) -> (i32, i32) {
    %c0_i32 = arith.constant 0 : i32
    %c0_i32_0 = arith.constant 0 : i32
    %c0_i32_1 = arith.constant 0 : i32
    return %c0_i32, %c0_i32_0 : i32, i32
  }
  func.func @transform_4(%arg0: i32) -> (i32, i32) {
    %c0_i32 = arith.constant 0 : i32
    %c0_i32_0 = arith.constant 0 : i32
    %c0_i32_1 = arith.constant 0 : i32
    return %c0_i32, %c0_i32_0 : i32, i32
  }
  func.func @transform_5(%arg0: i32) -> (i32, i32, i32) {
    %c0_i32 = arith.constant 0 : i32
    %c0_i32_0 = arith.constant 0 : i32
    %c0_i32_1 = arith.constant 0 : i32
    return %arg0, %c0_i32, %c0_i32_0 : i32, i32, i32
  }
}

</mosaic_0001>

<bundles_post_ra>
// kernel: tpu_custom_call.1
= control target key start
LH: loop header
LB: loop body
LE: loop exit
PB: predicated region body
PF: predicated region fallthrough
CT: control target
= control target key end

     0   :  { %s353_s0 = inlined_call_operand.vmem [shape: f32[128,32], index: 0, kind: input, shape index: {}]   ;;  %s354_s1 = inlined_call_operand.vmem [shape: bf16[32,128], index: 1, kind: input, shape index: {}]   ;;  %s355_s2 = inlined_call_operand.vmem [shape: f32[1,128], index: 2, kind: input, shape index: {}]   ;;  %s356_s3 = inlined_call_operand.vmem [shape: bf16[1,128], index: 3, kind: input, shape index: {}]   ;;  %s357_s4 = inlined_call_operand.<no memory space> [shape: f32[1,1], index: 4, kind: input, shape index: {}]   ;;  %s358_s5 = inlined_call_operand.hbm [shape: f32[1,1,128], index: 5, kind: output, shape index: {}]  }
   0x1   :  { %v215_v0 = vld [vmem:[%s354_s1 + $0x8] sm:$0xff]  ;;  %v214_v1 = vld [vmem:[%s354_s1] sm:$0xff] }
   0x2   :  { %217 = vmatpush.bf16.msra.mxu3 %v215_v0  ;;  %v31_v2 = vld [vmem:[%s353_s0 + $0x40] sm:$0xff]  ;;  %v32_v3 = vld [vmem:[%s353_s0 + $0x48] sm:$0xff]  ;;  %98 = vmatpush.bf16.msra.mxu0 %v215_v0 }
   0x3   :  { %216 = vmatpush.bf16.msra.mxu2 %v215_v0 }
   0x4   :  { %11 = vsyncpa [#allocation4], 0  ;;  %v43_v4 = vpack.c.bf16 %v32_v3, %v31_v2  ;;  %vm67_vm0 = vcmask 261120   ;;  %v33_v5 = vld [vmem:[%s353_s0 + $0x50] sm:$0xff]  ;;  %v34_v6 = vld [vmem:[%s353_s0 + $0x58] sm:$0xff]  ;;  %s248_s6 = smov [#allocation3]  }
   0x5   :  { %v44_v7 = vpack.c.bf16 %v34_v6, %v33_v5  ;;  %v23_v8 = vld [vmem:[%s353_s0] sm:$0xff]  ;;  %v24_v9 = vld [vmem:[%s353_s0 + $0x8] sm:$0xff]  ;;  %v29_v11 = vld [vmem:[%s353_s0 + $0x30] sm:$0xff]  ;;  %s187_s7 = sshll.u32 %s248_s6, 4  ;;  %s189_s10 = sshll.u32 %s358_s5, 4  ;;  %s188_s7 = int_to_ptr.vmem [resolvable:$true] %s187_s7  ;;  %s190_s10 = int_to_ptr.hbm [resolvable:$true] %s189_s10 }
   0x6   :  { %219 = vmatpush.bf16.msra.mxu3 %v214_v1  ;;  %99 = vmatpush.bf16.msra.mxu0 %v214_v1  ;;  %v39_v10 = vpack.c.bf16 %v24_v9, %v23_v8  ;;  %v30_v12 = vld [vmem:[%s353_s0 + $0x38] sm:$0xff]  ;;  %v35_v14 = vld [vmem:[%s353_s0 + $0x60] sm:$0xff]  ;;  %v36_v15 = vld [vmem:[%s353_s0 + $0x68] sm:$0xff] }
   0x7   :  { %218 = vmatpush.bf16.msra.mxu2 %v214_v1  ;;  %v42_v13 = vpack.c.bf16 %v30_v12, %v29_v11  ;;  %v45_v16 = vpack.c.bf16 %v36_v15, %v35_v14  ;;  %v25_v17 = vld [vmem:[%s353_s0 + $0x10] sm:$0xff]  ;;  %v26_v18 = vld [vmem:[%s353_s0 + $0x18] sm:$0xff]  ;;  %v27_v23 = vld [vmem:[%s353_s0 + $0x20] sm:$0xff] }
   0x8   :  { %v40_v19 = vpack.c.bf16 %v26_v18, %v25_v17  ;;  %v37_v20 = vld [vmem:[%s353_s0 + $0x70] sm:$0xff]  ;;  %v38_v21 = vld [vmem:[%s353_s0 + $0x78] sm:$0xff]  ;;  %v28_v24 = vld [vmem:[%s353_s0 + $0x28] sm:$0xff] }
   0x9   :  { %210 = vmatmul.msk.bf16.vlgmr.msra.gmra.mxu3 %vm67_vm0, %v43_v4  ;;  %206 = vmatmul.msk.bf16.vlgmr.msra.gmra.mxu0 %vm67_vm0, %v39_v10  ;;  %v46_v22 = vpack.c.bf16 %v38_v21, %v37_v20  ;;  %v41_v25 = vpack.c.bf16 %v28_v24, %v27_v23  ;;  %v221_v27 = vld [vmem:[%s355_s2] ss:$0 sm:$0xff]  ;;  %v167_v20 = vstv %s357_s4 }
   0xa   :  { %209 = vmatmul.msk.bf16.vlgmr.msra.gmra.mxu2 %vm67_vm0, %v42_v13 }
  0x19   :  { %211 = vmatmul.msk.bf16.gmra.mxu3 %vm67_vm0, %v44_v7  ;;  %207 = vmatmul.msk.bf16.gmra.mxu0 %vm67_vm0, %v40_v19  ;;  %v157_v19 = vld [vmem:[%s356_s3] sm:$0x1] }
  0x29   :  { %212 = vmatmul.msk.bf16.gmra.mxu3 %vm67_vm0, %v45_v16  ;;  %208 = vmatmul.msk.bf16.gmra.mxu0 %vm67_vm0, %v41_v25 }
  0x39   :  { %213 = vmatmul.msk.bf16.gmra.mxu3 %vm67_vm0, %v46_v22 }
  0x86   :  { %v101_v38 = vpop.f32.mrf.mxu0 }
  0x87   :  { %v102_v13 = vadd.f32 %v221_v27, %v101_v38 }
  0x89   :  { %v141_v16 = vmax.f32 %v102_v13, 0.0 }
  0x8c   :  { %v121_v26 = vpop.f32.mrf.mxu3 }
  0x8d   :  { %v122_v28 = vadd.f32 %v221_v27, %v121_v26  ;;  %v116_v56 = vpop.f32.mrf.mxu2 }
  0x8e   :  { %v103_v40 = vpop.f32.mrf.mxu0  ;;  %v117_v62 = vadd.f32 %v221_v27, %v116_v56 }
  0x8f   :  { %v149_v31 = vmax.f32 %v122_v28, 0.0  ;;  %v104_v14 = vadd.f32 %v221_v27, %v103_v40 }
  0x90   :  { %v147_v0 = vmax.f32 %v117_v62, 0.0 }
  0x91   :  { %v142_v17 = vmax.f32 %v104_v14, 0.0 }
  0x93   :  { %v158_v18 = vpack.c.bf16 %v142_v17, %v141_v16 }
  0x94   :  { %v123_v29 = vpop.f32.mrf.mxu3 }
  0x95   :  { %v124_v30 = vadd.f32 %v221_v27, %v123_v29  ;;  %v118_v61 = vpop.f32.mrf.mxu2 }
  0x96   :  { %v106_v46 = vpop.f32.mrf.mxu0  ;;  %v119_v63 = vadd.f32 %v221_v27, %v118_v61 }
  0x97   :  { %v150_v32 = vmax.f32 %v124_v30, 0.0  ;;  %v107_v8 = vadd.f32 %v221_v27, %v106_v46 }
  0x98   :  { %v148_v1 = vmax.f32 %v119_v63, 0.0 }
  0x99   :  { %v162_v33 = vpack.c.bf16 %v150_v32, %v149_v31  ;;  %v143_v11 = vmax.f32 %v107_v8, 0.0 }
  0x9a   :  { %v161_v5 = vpack.c.bf16 %v148_v1, %v147_v0 }
  0x9c   :  { %v126_v34 = vpop.f32.mrf.mxu3 }
  0x9d   :  { %v127_v55 = vadd.f32 %v221_v27, %v126_v34 }
  0x9e   :  { %v108_v54 = vpop.f32.mrf.mxu0 }
  0x9f   :  { %v151_v58 = vmax.f32 %v127_v55, 0.0  ;;  %v109_v9 = vadd.f32 %v221_v27, %v108_v54 }
  0xa1   :  { %v144_v12 = vmax.f32 %v109_v9, 0.0 }
  0xa3   :  { %v159_v15 = vpack.c.bf16 %v144_v12, %v143_v11 }
  0xa4   :  { %v128_v35 = vpop.f32.mrf.mxu3 }
  0xa5   :  { %v129_v52 = vadd.f32 %v221_v27, %v128_v35 }
  0xa6   :  { %v111_v60 = vpop.f32.mrf.mxu0 }
  0xa7   :  { %v152_v57 = vmax.f32 %v129_v52, 0.0  ;;  %v112_v3 = vadd.f32 %v221_v27, %v111_v60 }
  0xa9   :  { %v163_v59 = vpack.c.bf16 %v152_v57, %v151_v58  ;;  %v145_v6 = vmax.f32 %v112_v3, 0.0 }
  0xac   :  { %v131_v36 = vpop.f32.mrf.mxu3 }
  0xad   :  { %v132_v49 = vadd.f32 %v221_v27, %v131_v36 }
  0xae   :  { %v113_v2 = vpop.f32.mrf.mxu0 }
  0xaf   :  { %v153_v51 = vmax.f32 %v132_v49, 0.0  ;;  %v114_v4 = vadd.f32 %v221_v27, %v113_v2 }
  0xb1   :  { %v146_v7 = vmax.f32 %v114_v4, 0.0 }
  0xb3   :  { %v160_v10 = vpack.c.bf16 %v146_v7, %v145_v6 }
  0xb4   :  { %v133_v37 = vpop.f32.mrf.mxu3 }
  0xb5   :  { %v134_v47 = vadd.f32 %v221_v27, %v133_v37 }
  0xb7   :  { %v154_v50 = vmax.f32 %v134_v47, 0.0 }
  0xb9   :  { %v164_v53 = vpack.c.bf16 %v154_v50, %v153_v51 }
  0xbc   :  { %v136_v39 = vpop.f32.mrf.mxu3 }
  0xbd   :  { %v137_v41 = vadd.f32 %v221_v27, %v136_v39 }
  0xbf   :  { %v155_v44 = vmax.f32 %v137_v41, 0.0 }
  0xc4   :  { %v138_v42 = vpop.f32.mrf.mxu3 }
  0xc5   :  { %v139_v43 = vadd.f32 %v221_v27, %v138_v42 }
  0xc7   :  { %v156_v45 = vmax.f32 %v139_v43, 0.0 }
  0xc9   :  { %v165_v48 = vpack.c.bf16 %v156_v45, %v155_v44 }
  0xcb   :  { %168 = vmatpush.bf16.xpose.msra.mxu1 %v165_v48 }
  0xd3   :  { %169 = vmatpush.bf16.xpose.msra.mxu1 %v164_v53 }
  0xdb   :  { %170 = vmatpush.bf16.xpose.msra.mxu1 %v163_v59 }
  0xe3   :  { %171 = vmatpush.bf16.xpose.msra.mxu1 %v162_v33 }
  0xeb   :  { %172 = vmatpush.bf16.xpose.msra.mxu1 %v161_v5 }
  0xf3   :  { %173 = vmatpush.bf16.xpose.msra.mxu1 %v160_v10 }
  0xfb   :  { %174 = vmatpush.bf16.xpose.msra.mxu1 %v159_v15 }
 0x103   :  { %175 = vmatpush.bf16.xpose.msra.mxu1 %v158_v18 }
 0x10a   :  { %176 = vmatmul.bf16.vlgmr.msra.gmra.mxu1 %v157_v19 }
 0x187   :  { %v177_v21 = vpop.f32.mrf.mxu1 }
 0x188   :  { %v178_v22 = vadd.f32 %v177_v21, %v167_v20 }
 0x18a   :  { %181 = vst [vmem:[#allocation3] sm:$0x1] %v178_v22 }
 0x18b   :  { %192 = dma.vmem_to_hbm [thread:$0]  %s188_s7, 16, %s190_s10, [#allocation4]  }
 0x18f   :  { %v179_v23 = vpop.f32.mrf.mxu1 }
 0x190   :  { %246 = dma.done.wait [#allocation4], 16  }
 0x191   :  { %247 = vsyncadd [#allocation4], 4294967280 }
 0x192   :  { %197 = vsyncpa [#allocation4], 1 }

</bundles_post_ra>
